<compile_context>
chip_gen: v6e
topology: v6e:2x2x1
jax: 0.10.0
libtpu: 0.0.40
codegen_flags: <defaults>
</compile_context>

<pallas_src>
import functools

import jax
import jax.numpy as jnp
from jax.experimental import pallas as pl
from jax.experimental.pallas import tpu as pltpu


def _patch_embed_kernel(p_ref, w_ref, b_ref, o_ref):
    # p_ref: (tm, K) bf16 patch rows; w_ref: (K, Dp) bf16; b_ref: (1, Dp) f32
    acc = jnp.dot(p_ref[...], w_ref[...], preferred_element_type=jnp.float32)
    o_ref[...] = (acc + b_ref[...]).astype(o_ref.dtype)


def patch_embed_forward(x, weight, bias, patch_size, *, compute_dtype=jnp.bfloat16):
    """x: (B, C, H, W); weight: (D, C, p, p); bias: (D,). Returns (B, N, D)."""
    B, C, H, W = x.shape
    p = patch_size
    D = weight.shape[0]
    assert H % p == 0 and W % p == 0, "spatial dims must be divisible by patch size"
    Hp, Wp = H // p, W // p
    N = Hp * Wp
    K = C * p * p
    M = B * N
    out_dtype = x.dtype

    # Lane-dense output: pad D up to 128 only when smaller (a sub-128 output
    # last dim forces masked vst.msk partial stores).
    Dp = 128 if D < 128 else D

    # ---- glue (fused into the pallas_call input DMA via allow_input_fusion) ----
    patches = x.reshape(B, C, Hp, p, Wp, p)
    patches = jnp.transpose(patches, (0, 2, 4, 1, 3, 5)).reshape(M, K)
    patches = patches.astype(compute_dtype)

    w2d = weight.reshape(D, K).T.astype(compute_dtype)            # (K, D)
    b1d = bias.astype(jnp.float32)
    if Dp != D:
        w2d = jnp.pad(w2d, ((0, 0), (0, Dp - D)))
        b1d = jnp.pad(b1d, (0, Dp - D))
    b2d = b1d.reshape(1, Dp)

    in_b = jnp.dtype(compute_dtype).itemsize
    out_b = jnp.dtype(out_dtype).itemsize

    def vmem_bytes(tm):
        # double-buffered patch + output tiles, (conservatively) double-buffered
        # resident weight/bias blocks.
        return (2 * tm * K * in_b + 2 * K * Dp * in_b
                + 2 * Dp * 4 + 2 * tm * Dp * out_b)

    VMEM_BUDGET = 40 << 20          # headroom under v7x's 64 MiB physical VMEM
    tm = 2048
    while tm > 8 and vmem_bytes(tm) > VMEM_BUDGET:
        tm //= 2
    while tm > 8 and pl.cdiv(M, tm) < 2:
        tm //= 2                    # keep >= 2 grid steps for 2-TC sharding
    if M < tm:
        tm = M                      # full-extent block is always legal

    grid = (pl.cdiv(M, tm),)
    vmem_limit = min(56 << 20, max(32 << 20, vmem_bytes(tm) + (8 << 20)))

    cost = pl.CostEstimate(
        flops=2 * M * K * Dp,
        transcendentals=0,
        bytes_accessed=M * K * in_b + K * Dp * in_b + M * Dp * out_b,
    )

    out = pl.pallas_call(
        _patch_embed_kernel,
        out_shape=jax.ShapeDtypeStruct((M, Dp), out_dtype),
        grid_spec=pltpu.PrefetchScalarGridSpec(
            num_scalar_prefetch=0,
            grid=grid,
            in_specs=[
                pl.BlockSpec((tm, K), lambda i: (i, 0)),
                pl.BlockSpec((K, Dp), lambda i: (0, 0)),
                pl.BlockSpec((1, Dp), lambda i: (0, 0)),
            ],
            out_specs=pl.BlockSpec((tm, Dp), lambda i: (i, 0)),
        ),
        compiler_params=pltpu.CompilerParams(
            dimension_semantics=("parallel",),
            vmem_limit_bytes=vmem_limit,
            allow_input_fusion=[True, False, False],
        ),
        cost_estimate=cost,
    )(patches, w2d, b2d)

    if Dp != D:
        out = out[:, :D]
    return out.reshape(B, N, D)


if __name__ == "__main__":
    # Small shapes consistent with the module defaults (patch=2, in_chans=3,
    # embed_dim=192) at reduced spatial size 16x16 -> num_patches = 64.
    B, C, H, W = 2, 3, 16, 16
    p = 2
    D = 192

    key = jax.random.PRNGKey(0)
    kx, kw, kb = jax.random.split(key, 3)
    x = jax.random.normal(kx, (B, C, H, W), dtype=jnp.float32)
    # Conv2d parameters: weight (D, C, p, p), bias (D,)
    weight = jax.random.normal(kw, (D, C, p, p), dtype=jnp.float32) * 0.02
    bias = jax.random.normal(kb, (D,), dtype=jnp.float32) * 0.02

    fwd = jax.jit(functools.partial(patch_embed_forward, patch_size=p))
    y = fwd(x, weight, bias)
    jax.block_until_ready(y)

    # Reference: same bf16 input/weight cast as the kernel, f32 accumulate.
    N = (H // p) * (W // p)
    K = C * p * p
    patches_ref = x.reshape(B, C, H // p, p, W // p, p)
    patches_ref = jnp.transpose(patches_ref, (0, 2, 4, 1, 3, 5)).reshape(B, N, K)
    pr = patches_ref.astype(jnp.bfloat16).astype(jnp.float32)
    wr = weight.reshape(D, K).T.astype(jnp.bfloat16).astype(jnp.float32)
    y_ref = pr @ wr + bias

    assert y.shape == (B, N, D)
    assert jnp.allclose(y, y_ref, atol=1e-3, rtol=1e-3), float(jnp.max(jnp.abs(y - y_ref)))

    print("KERNEL_OK")
</pallas_src>

<mosaic_0001>
module attributes {stable_mosaic.version = 11 : i64} {
  func.func @_patch_embed_kernel(%arg0: i32, %arg1: memref<64x12xbf16, #tpu.memory_space<vmem>>, %arg2: memref<12x192xbf16, #tpu.memory_space<vmem>>, %arg3: memref<1x192xf32, #tpu.memory_space<vmem>>, %arg4: memref<64x192xf32, #tpu.memory_space<vmem>>) attributes {dimension_semantics = [#tpu.dimension_semantics<parallel>], iteration_bounds = array<i64: 2>, scalar_prefetch = 0 : i64, scratch_operands = 0 : i64, tpu.core_type = #tpu.core_type<tc>, window_params = [{transform_indices = @transform_0, window_bounds = array<i64: 64, 12>}, {pipeline_mode = #tpu.pipeline_mode<synchronous>, transform_indices = @transform_1, window_bounds = array<i64: 12, 192>}, {pipeline_mode = #tpu.pipeline_mode<synchronous>, transform_indices = @transform_2, window_bounds = array<i64: 1, 192>}, {transform_indices = @transform_3, window_bounds = array<i64: 64, 192>}]} {
    %c0 = arith.constant 0 : index
    %c0_0 = arith.constant 0 : index
    %0 = vector.load %arg1[%c0, %c0_0] : memref<64x12xbf16, #tpu.memory_space<vmem>>, vector<64x12xbf16>
    %c0_1 = arith.constant 0 : index
    %c0_2 = arith.constant 0 : index
    %1 = vector.load %arg2[%c0_1, %c0_2] : memref<12x192xbf16, #tpu.memory_space<vmem>>, vector<12x192xbf16>
    %cst = arith.constant dense<0.000000e+00> : vector<64x192xf32>
    %2 = tpu.matmul %0, %1, %cst {dimension_numbers = #tpu.dot_dimension_numbers<[1], [0], [0], [1], [0, 0, 1, 1], [], []>} : vector<64x12xbf16>, vector<12x192xbf16>, vector<64x192xf32> -> vector<64x192xf32>
    %c0_3 = arith.constant 0 : index
    %c0_4 = arith.constant 0 : index
    %3 = vector.load %arg3[%c0_3, %c0_4] : memref<1x192xf32, #tpu.memory_space<vmem>>, vector<1x192xf32>
    %4 = vector.broadcast %3 : vector<1x192xf32> to vector<64x192xf32>
    %5 = arith.addf %2, %4 : vector<64x192xf32>
    %c0_5 = arith.constant 0 : index
    %c0_6 = arith.constant 0 : index
    %6 = vector.load %arg4[%c0_5, %c0_6] : memref<64x192xf32, #tpu.memory_space<vmem>>, vector<64x192xf32>
    tpu.vector_store %arg4[%c0_5, %c0_6], %5 {strides = array<i32>} : memref<64x192xf32, #tpu.memory_space<vmem>>, vector<64x192xf32>,
    return
  }
  func.func @transform_0(%arg0: i32) -> (i32, i32) {
    %c0_i32 = arith.constant 0 : i32
    %c0_i32_0 = arith.constant 0 : i32
    return %arg0, %c0_i32 : i32, i32
  }
  func.func @transform_1(%arg0: i32) -> (i32, i32) {
    %c0_i32 = arith.constant 0 : i32
    %c0_i32_0 = arith.constant 0 : i32
    %c0_i32_1 = arith.constant 0 : i32
    return %c0_i32, %c0_i32_0 : i32, i32
  }
  func.func @transform_2(%arg0: i32) -> (i32, i32) {
    %c0_i32 = arith.constant 0 : i32
    %c0_i32_0 = arith.constant 0 : i32
    %c0_i32_1 = arith.constant 0 : i32
    return %c0_i32, %c0_i32_0 : i32, i32
  }
  func.func @transform_3(%arg0: i32) -> (i32, i32) {
    %c0_i32 = arith.constant 0 : i32
    %c0_i32_0 = arith.constant 0 : i32
    return %arg0, %c0_i32 : i32, i32
  }
}

</mosaic_0001>

<bundles_post_ra>
// kernel: patch_embed_forward.1
= control target key start
LH: loop header
LB: loop body
LE: loop exit
PB: predicated region body
PF: predicated region fallthrough
CT: control target
= control target key end

     0   :  { %8 = vsyncpa [#allocation3], 0  ;;  %s714_s0 = inlined_call_operand.vmem [shape: bf16[128,12], index: 0, kind: input, shape index: {}]   ;;  %s715_s1 = inlined_call_operand.vmem [shape: bf16[12,192], index: 1, kind: input, shape index: {}]   ;;  %s716_s2 = inlined_call_operand.vmem [shape: f32[1,192], index: 2, kind: input, shape index: {}]   ;;  %s717_s3 = inlined_call_operand.hbm [shape: f32[128,192], index: 3, kind: output, shape index: {}]  }
   0x1   :  { %10 = vsyncpa [#allocation3 + $0x1], 0  ;;  %s573_s12 = smov 0   ;;  %s575_s13 = smov 0  }
   0x2   :  { %s577_s14 = smov 0   ;;  %s579_s15 = smov 0  }
   0x3 LB: > { %s594_s16 = sadd.s32 4294967295, %s547_s15   ;;  %s410_s17 = sadd.s32 4294967294, %s547_s15   ;;  %s547_s15 = sphi %s579_s15, %s723_s15   ;;  %s543_s14 = sphi %s577_s14, %s722_s14   ;;  %s539_s13 = sphi %s575_s13, %s721_s13   ;;  %s535_s12 = sphi %s573_s12, %s720_s12  }
   0x4   : > { %s598_s18 = sadd.s32 1, %s547_s15   ;;  %s91_s19 = sadd.s32 1, %s543_s14 }
   0x5   : > { %s88_s20 = ssub.s32 %s547_s15, %s598_s18  ;;  %p101_p0 = scmp.ne.s32.totalorder %s543_s14, %s539_s13 }
   0x6   : > { %p89_p1 = scmp.eq.s32.totalorder %s88_s20, 0  ;;  %p102_p2 = scmp.eq.s32.totalorder %s594_s16, 1 }
   0x7   : > { %p107_p3 = scmp.ne.s32.totalorder %s539_s13, %s535_s12  ;;  %p108_p4 = scmp.eq.s32.totalorder %s410_s17, 1 }
   0x8   : > { %s609_s21 = scalar_select %p89_p1, %s543_s14, %s91_s19  }
   0x9   : > { %p611_p5 = por %p102_p2, %p101_p0  ;;  %p615_p6 = por %p108_p4, %p107_p3 }
   0xa   : > { %p413_p7 = scmp.ge.s32.totalorder %s547_s15, 1  ;;  %p141_p8 = scmp.lt.s32.totalorder %s547_s15, 3 }
   0xc   : > { %p142_p9 = pnand %p413_p7, %p141_p8 }
   0xd   : > { %s415_s28 = sshll.u32 (!%p142_p9), %s594_s16, 3  ;;  %s162_s6 = sand.u32 (!%p142_p9), 1, %s539_s13  }
   0xe   : > { %145 = sbr.rel (%p142_p9) target bundleno = 248 (0xf8), region = 32  ;;  %p166_p10 = scmp.lt.s32.totalorder (!%p142_p9), %s415_s28, 15 }
   0xf   : > { %s414_s9 = sshll.u32 (!%p142_p9), %s162_s6, 7  ;;  %s435_s11 = sshll.u32 (!%p142_p9), %s594_s16, 11 }
  0x10   : > { %s637_s10 = scalar_lea.vmem (!%p142_p9), [#allocation2], %s414_s9  ;;  %s663_s24 = scalar_lea.hbm (!%p142_p9), %s717_s3, %s435_s11 }
  0x11   : > { %s348_s17 = sshll.u32 (!%p142_p9), %s637_s10, 4  ;;  %s674_s16 = scalar_lea.sflag (!%p142_p9), [#allocation3], %s162_s6  ;;  %s665_s17 = int_to_ptr.vmem [resolvable:$true] %s348_s17 }
  0x12   : > { %s487_s25 = scalar_lea.vmem (!%p142_p9), %s665_s17, 2048  ;;  %s550_s26 = smov (!%p142_p9), [#allocation2]  }
  0x13   : > { %v480_v0 = vld [vmem:[%s715_s1 + $0x4] ss:$8 sps:$4 sm:$0x3f]   ;;  %vm236_vm0 = vcmask 1045504   ;;  %v549_v3 = vmov 0   ;;  %s725_s28 = smov (!%p166_p10, %s415_s28), 15  ;;  %v185_v8 = vlaneseq  ;;  %p488_p11 = scmp.ne.s32.totalorder %s665_s17, %s487_s25 }
  0x14   : > { %v482_v1 = vld [vmem:[%s715_s1] ss:$8 sps:$4 sm:$0x3f]   ;;  %423 = vmatprep.subr.msk.bf16.mxu0 %vm236_vm0, %v480_v0  ;;  %436 = vmatprep.subr.msk.bf16.mxu1 %vm236_vm0, %v480_v0  ;;  %s416_s29 = sshll.u32 %s725_s28, 2  ;;  %vm223_vm1 = vcmask 97280   ;;  %vm317_vm2 = vcmask 523264  }
  0x15   : > { %v238_v2 = vsel %vm236_vm0, %v482_v1, 0  ;;  %275 = vmatprep.mubr.bf16.mxu0 %v549_v3  ;;  %295 = vmatprep.mubr.bf16.mxu1 %v549_v3  ;;  %s169_s5 = scalar_lea.vmem %s714_s0, %s416_s29  ;;  %v186_v9 = vshrl.u32 %v185_v8, 7  ;;  %v183_v11 = vld [vmem:[%s716_s2] sm:$0x3]  ;;  %p489_p12 = pnand %p488_p11, %p611_p5 }
  0x16   : > { %258 = vmatpush1.bf16.msra.mxu0 %v238_v2  ;;  %437 = vmatpush1.bf16.msra.mxu1 %v238_v2  ;;  %v483_v4 = vld [vmem:[%s169_s5] sm:$0xff]   ;;  %v484_v5 = vld [vmem:[%s169_s5 + $0x10] sm:$0xff]   ;;  %v485_v6 = vld [vmem:[%s169_s5 + $0x8] sm:$0xff]   ;;  %s491_s27 = sshll.u32 %s550_s26, 4  ;;  %s492_s27 = int_to_ptr.vmem [resolvable:$false] %s491_s27 }
  0x17   : > { %v486_v7 = vld [vmem:[%s169_s5 + $0x18] sm:$0xff]   ;;  %v187_v10 = vsub.s32 0, %v186_v9  ;;  %v191_v12 = vsub.s32 1, %v186_v9  ;;  %p490_p13 = pneg %p489_p12  ;;  %s493_s28 = scalar_lea.vmem %s492_s27, 4096 }
  0x18   : > { %p494_p0 = scmp.lt.s32.totalorder %s665_s17, %s492_s27  ;;  %p495_p1 = scmp.lt.s32.totalorder %s493_s28, %s487_s25 }
  0x19   : > { %424 = vmatmul.mubr.msk.bf16.vlgmr.msra.gmra.mxu0 %vm223_vm1, %v483_v4  ;;  %426 = vmatmul.mubr.msk.bf16.vlgmr.msra.gmra.mxu1 %vm223_vm1, %v484_v5  ;;  %v188_v13 = vrot.slane %v183_v11, %v187_v10  ;;  %v192_v14 = vrot.slane %v183_v11, %v191_v12 }
  0x1a   : > { %285 = vmatprep.mubr.bf16.mxu0 %v549_v3  ;;  %305 = vmatprep.mubr.bf16.mxu1 %v549_v3  ;;  %p496_p2 = por %p495_p1, %p494_p0 }
  0x1c   : > { %p497_p3 = pnand %p496_p2, %p490_p13 }
  0x21   : > { %425 = vmatmul.mubr.msk.bf16.gmra.mxu0 %vm223_vm1, %v485_v6  ;;  %427 = vmatmul.mubr.msk.bf16.gmra.mxu1 %vm223_vm1, %v486_v7 }
  0xd9   : > { %v277_v15 = vpop.f32.mrf.mxu0  ;;  %v297_v17 = vpop.f32.mrf.mxu1 }
  0xda   : > { %v278_v16 = vadd.f32 %v277_v15, %v188_v13  ;;  %v298_v18 = vadd.f32 %v297_v17, %v188_v13 }
  0xdb   : > { %v279_v19 = vpop.f32.mrf.mxu0  ;;  %v299_v21 = vpop.f32.mrf.mxu1 }
  0xdc   : > { %316 = vst [vmem:[%s637_s10] sm:$0xff] %v278_v16  ;;  %v280_v20 = vadd.f32 %v279_v19, %v192_v14  ;;  %325 = vst [vmem:[%s637_s10 + $0x40] sm:$0xff] %v298_v18  ;;  %v300_v22 = vadd.f32 %v299_v21, %v192_v14 }
  0xdd   : > { %v281_v23 = vpop.f32.mrf.mxu0  ;;  %v301_v25 = vpop.f32.mrf.mxu1 }
  0xde   : > { %318 = vst.msk [vmem:[%s637_s10 + $0x8] sm:$0xff] %vm317_vm2, %v280_v20  ;;  %v282_v24 = vadd.f32 %v281_v23, %v188_v13  ;;  %326 = vst.msk [vmem:[%s637_s10 + $0x48] sm:$0xff] %vm317_vm2, %v300_v22  ;;  %v302_v26 = vadd.f32 %v301_v25, %v188_v13 }
  0xdf   : > { %v283_v27 = vpop.f32.mrf.mxu0  ;;  %v303_v29 = vpop.f32.mrf.mxu1 }
  0xe0   : > { %319 = vst [vmem:[%s637_s10 + $0x10] sm:$0xff] %v282_v24  ;;  %v284_v28 = vadd.f32 %v283_v27, %v192_v14  ;;  %327 = vst [vmem:[%s637_s10 + $0x50] sm:$0xff] %v302_v26  ;;  %v304_v30 = vadd.f32 %v303_v29, %v192_v14 }
  0xe1   : > { %v287_v31 = vpop.f32.mrf.mxu0  ;;  %v307_v33 = vpop.f32.mrf.mxu1 }
  0xe2   : > { %320 = vst.msk [vmem:[%s637_s10 + $0x18] sm:$0xff] %vm317_vm2, %v284_v28  ;;  %v288_v32 = vadd.f32 %v287_v31, %v188_v13  ;;  %328 = vst.msk [vmem:[%s637_s10 + $0x58] sm:$0xff] %vm317_vm2, %v304_v30  ;;  %v308_v34 = vadd.f32 %v307_v33, %v188_v13 }
  0xe3   : > { %v289_v35 = vpop.f32.mrf.mxu0  ;;  %v309_v37 = vpop.f32.mrf.mxu1 }
  0xe4   : > { %321 = vst [vmem:[%s637_s10 + $0x20] sm:$0xff] %v288_v32  ;;  %v290_v36 = vadd.f32 %v289_v35, %v192_v14  ;;  %329 = vst [vmem:[%s637_s10 + $0x60] sm:$0xff] %v308_v34  ;;  %v310_v38 = vadd.f32 %v309_v37, %v192_v14 }
  0xe5   : > { %v291_v39 = vpop.f32.mrf.mxu0  ;;  %v311_v41 = vpop.f32.mrf.mxu1 }
  0xe6   : > { %322 = vst.msk [vmem:[%s637_s10 + $0x28] sm:$0xff] %vm317_vm2, %v290_v36  ;;  %v292_v40 = vadd.f32 %v291_v39, %v188_v13  ;;  %330 = vst.msk [vmem:[%s637_s10 + $0x68] sm:$0xff] %vm317_vm2, %v310_v38  ;;  %v312_v42 = vadd.f32 %v311_v41, %v188_v13 }
  0xe7   : > { %v293_v43 = vpop.f32.mrf.mxu0  ;;  %v313_v45 = vpop.f32.mrf.mxu1 }
  0xe8   : > { %323 = vst [vmem:[%s637_s10 + $0x30] sm:$0xff] %v292_v40  ;;  %v294_v44 = vadd.f32 %v293_v43, %v192_v14  ;;  %331 = vst [vmem:[%s637_s10 + $0x70] sm:$0xff] %v312_v42  ;;  %v314_v46 = vadd.f32 %v313_v45, %v192_v14 }
  0xea   : > { %324 = vst.msk [vmem:[%s637_s10 + $0x38] sm:$0xff] %vm317_vm2, %v294_v44  ;;  %332 = vst.msk [vmem:[%s637_s10 + $0x78] sm:$0xff] %vm317_vm2, %v314_v46 }
  0xeb   : > { %500 = shalt.err (!%p497_p3)
}
  0xec   : > { %s501_s29 = scalar_lea.hbm %s663_s24, 2048  ;;  %s505_s5 = scalar_lea.hbm %s717_s3, 4096 }
  0xed   : > { %p502_p4 = scmp.ne.s32.totalorder %s663_s24, %s501_s29  ;;  %p506_p9 = scmp.lt.s32.totalorder %s663_s24, %s717_s3 }
  0xee   : > { %p507_p10 = scmp.lt.s32.totalorder %s505_s5, %s501_s29 }
  0xef   : > { %p503_p7 = pnand %p502_p4, %p611_p5 }
  0xf0   : > { %p508_p11 = por %p507_p10, %p506_p9 }
  0xf1   : > { %p504_p8 = pneg %p503_p7 }
  0xf3   : > { %p509_p12 = pnand %p508_p11, %p504_p8 }
  0xf5   : > { %512 = shalt.err (!%p509_p12)
}
  0xf6   : > { %s551_s8 = smov 256   ;;  %s552_s9 = smov 16  }
  0xf7   : > { %438 = dma.vmem_to_hbm [thread:$0]  (%p611_p5), %s665_s17, 2048, %s663_s24, %s674_s16, %s551_s8, %s551_s8, %s552_s9  }
  0xf8 PF: > { %p444_p13 = scmp.ge.s32.totalorder %s547_s15, 2  ;;  %s363_s10 = sand.u32 1, %s535_s12  }
  0xf9   : > { %s364_s11 = scalar_lea.sflag [#allocation3], %s363_s10 }
  0xfa   : > { %p441_p0 = pnand %p444_p13, %p615_p6 }
  0xfc   : > { %p442_p1 = pneg %p441_p0 }
  0xfe   : > { %530 = dma.done.wait (%p442_p1), %s364_s11, 2048  }
  0xff   : > { %532 = vsyncadd (%p442_p1), %s364_s11, 4294965248  ;;  %p13_p2 = scmp.ge.s32.totalorder %s598_s18, 4   ;;  %s720_s12 = smov %s539_s13 }
 0x100   : > { %s721_s13 = smov %s543_s14  ;;  %s722_s14 = smov %s609_s21 }
 0x101   : > { %s723_s15 = smov %s598_s18  ;;  %15 = sbr.rel (!%p13_p2) target bundleno = 3 (0x3), region = 67 }
 0x106   :  { %369 = vsyncpa [#allocation3], 1 }
 0x107   :  { %371 = vsyncpa [#allocation3 + $0x1], 1 }

</bundles_post_ra>
